<compile_context>
chip_gen: v6e
topology: v6e:2x2x1
jax: 0.10.0
libtpu: 0.0.40
codegen_flags: <defaults>
</compile_context>

<pallas_src>
import functools

import jax
import jax.numpy as jnp
from jax.experimental import pallas as pl
from jax.experimental.pallas import tpu as pltpu

_LANES = 128
_GATHER_CLASS_THRESHOLD = 16   # beyond this, gather w[y_true] in the wrapper


def _round_up(x, m):
    return ((x + m - 1) // m) * m


# ---------------------------------------------------------------------------
# Kernels
# ---------------------------------------------------------------------------

def _accuracy_plain_kernel(yp_ref, yt_ref, acc_ref, t_ref, cnt_acc, *, n_total):
    pid = pl.program_id(0)

    @pl.when(pid == 0)
    def _init():
        cnt_acc[...] = jnp.zeros_like(cnt_acc)

    # int32 match accumulation: no per-element int->f32 cast, exact for huge N.
    cnt_acc[...] += (yt_ref[...] == yp_ref[...]).astype(jnp.int32)

    @pl.when(pid == pl.num_programs(0) - 1)
    def _emit():
        c = jnp.sum(cnt_acc[...]).astype(jnp.float32).reshape(1, 1)
        acc_ref[...] = c / jnp.float32(n_total)   # torch: t = y_pred.shape[0]
        t_ref[...] = jnp.full((1, 1), n_total, jnp.float32)


def _accuracy_weighted_kernel(w_ref, yp_ref, yt_ref, acc_ref, t_ref,
                              c_acc, t_acc, wyt, *, num_classes):
    """Small-C path: weight table in SMEM, one VPU pass per class."""
    pid = pl.program_id(0)

    @pl.when(pid == 0)
    def _init():
        c_acc[...] = jnp.zeros_like(c_acc)
        t_acc[...] = jnp.zeros_like(t_acc)

    yt = yt_ref[...]          # (tile_rows, 128) int32

    # Build w[y_true] for this tile: one select+add pass per class, statically
    # unrolled (num_classes <= _GATHER_CLASS_THRESHOLD). Padded lanes carry
    # y_true == -1, which matches no class -> weight 0.
    wyt[...] = jnp.zeros_like(wyt)
    for c in range(num_classes):
        wyt[...] += jnp.where(yt == c, w_ref[c], jnp.float32(0.0))

    w_tile = wyt[...]
    t_acc[...] += w_tile
    c_acc[...] += w_tile * (yt == yp_ref[...]).astype(jnp.float32)

    @pl.when(pid == pl.num_programs(0) - 1)
    def _emit():
        c = jnp.sum(c_acc[...]).reshape(1, 1)
        t = jnp.sum(t_acc[...]).reshape(1, 1)
        acc_ref[...] = c / t
        t_ref[...] = t


def _accuracy_gathered_kernel(wg_ref, yp_ref, yt_ref, acc_ref, t_ref,
                              c_acc, t_acc):
    """Large-C path: w[y_true] gathered in the wrapper (padded lanes = 0)."""
    pid = pl.program_id(0)

    @pl.when(pid == 0)
    def _init():
        c_acc[...] = jnp.zeros_like(c_acc)
        t_acc[...] = jnp.zeros_like(t_acc)

    w_tile = wg_ref[...]
    t_acc[...] += w_tile
    c_acc[...] += w_tile * (yt_ref[...] == yp_ref[...]).astype(jnp.float32)

    @pl.when(pid == pl.num_programs(0) - 1)
    def _emit():
        c = jnp.sum(c_acc[...]).reshape(1, 1)
        t = jnp.sum(t_acc[...]).reshape(1, 1)
        acc_ref[...] = c / t
        t_ref[...] = t


# ---------------------------------------------------------------------------
# Wrapper
# ---------------------------------------------------------------------------

def _tiling(n, max_tile_rows):
    rows = -(-max(n, 1) // _LANES)
    tile_rows = min(max_tile_rows, _round_up(rows, 8))
    rows_padded = _round_up(rows, tile_rows)
    return tile_rows, rows_padded


def _pad1d(x, n_padded, fill):
    pad = n_padded - x.shape[0]
    if pad:
        x = jnp.concatenate([x, jnp.full((pad,), fill, x.dtype)])
    return x


def accuracy(y_pred, y_true, weight=None, *, max_tile_rows=None):
    """Pallas equivalent of Accuracy.forward(y_pred, y_true) -> (c/t, t)."""
    n = int(y_pred.shape[0])
    weighted = weight is not None
    num_classes = int(weight.shape[0]) if weighted else 0
    use_gather = weighted and num_classes > _GATHER_CLASS_THRESHOLD

    if max_tile_rows is None:
        # HBM-bound reduction: biggest tiles that keep double-buffered inputs
        # plus scratch far below the scoped-VMEM default on every generation.
        max_tile_rows = 512 if weighted else 1024

    tile_rows, rows_padded = _tiling(n, max_tile_rows)
    n_padded = rows_padded * _LANES
    num_tiles = rows_padded // tile_rows

    # Distinct sentinels: padded y_pred never equals padded y_true, and the
    # padded y_true (-1) never matches a valid class index.
    yp2 = _pad1d(y_pred.astype(jnp.int32), n_padded, -2).reshape(rows_padded, _LANES)
    yt2 = _pad1d(y_true.astype(jnp.int32), n_padded, -1).reshape(rows_padded, _LANES)

    data_spec = pl.BlockSpec((tile_rows, _LANES), lambda i: (i, 0))
    scalar_out = pl.BlockSpec((1, 1), lambda i: (0, 0))
    out_shape = (jax.ShapeDtypeStruct((1, 1), jnp.float32),
                 jax.ShapeDtypeStruct((1, 1), jnp.float32))
    cparams = pltpu.CompilerParams(dimension_semantics=("arbitrary",))
    f32_acc = pltpu.VMEM((tile_rows, _LANES), jnp.float32)

    if not weighted:
        acc, t = pl.pallas_call(
            functools.partial(_accuracy_plain_kernel, n_total=n),
            out_shape=out_shape,
            grid=(num_tiles,),
            in_specs=[data_spec, data_spec],
            out_specs=(scalar_out, scalar_out),
            scratch_shapes=[pltpu.VMEM((tile_rows, _LANES), jnp.int32)],
            compiler_params=cparams,
        )(yp2, yt2)
    elif use_gather:
        wg = jnp.take(weight.astype(jnp.float32), y_true, axis=0)
        wg2 = _pad1d(wg, n_padded, 0.0).reshape(rows_padded, _LANES)
        acc, t = pl.pallas_call(
            _accuracy_gathered_kernel,
            out_shape=out_shape,
            grid=(num_tiles,),
            in_specs=[data_spec, data_spec, data_spec],
            out_specs=(scalar_out, scalar_out),
            scratch_shapes=[f32_acc, f32_acc],
            compiler_params=cparams,
        )(wg2, yp2, yt2)
    else:
        w = weight.astype(jnp.float32)
        acc, t = pl.pallas_call(
            functools.partial(_accuracy_weighted_kernel, num_classes=num_classes),
            out_shape=out_shape,
            grid=(num_tiles,),
            in_specs=[pl.BlockSpec(memory_space=pltpu.MemorySpace.SMEM),
                      data_spec, data_spec],
            out_specs=(scalar_out, scalar_out),
            scratch_shapes=[f32_acc, f32_acc, f32_acc],
            compiler_params=cparams,
        )(w, yp2, yt2)

    return acc[0, 0], t[0, 0]


if __name__ == "__main__":
    key = jax.random.PRNGKey(0)
    k1, k2, k3, k4 = jax.random.split(key, 4)

    # --- small case (matches the torch module's typical use) ---
    N, C = 8, 4
    y_true = jax.random.randint(k1, (N,), 0, C, dtype=jnp.int32)
    y_pred = jax.random.randint(k2, (N,), 0, C, dtype=jnp.int32)
    weight = jnp.arange(1, C + 1, dtype=jnp.float32) * 0.5

    acc_w, t_w = accuracy(y_pred, y_true, weight)
    jax.block_until_ready((acc_w, t_w))
    w_g = weight[y_true]
    c_ref = jnp.sum(w_g * (y_true == y_pred).astype(jnp.float32))
    t_ref = jnp.sum(w_g)
    assert jnp.allclose(acc_w, c_ref / t_ref, rtol=1e-6, atol=1e-6)
    assert jnp.allclose(t_w, t_ref, rtol=1e-6, atol=1e-6)

    acc_p, t_p = accuracy(y_pred, y_true, None)
    jax.block_until_ready((acc_p, t_p))
    ref_acc_p = jnp.mean((y_true == y_pred).astype(jnp.float32))
    assert jnp.allclose(acc_p, ref_acc_p, rtol=1e-6, atol=1e-6)
    assert jnp.allclose(t_p, jnp.float32(N), rtol=1e-6, atol=1e-6)

    # --- non-multiple-of-128 N with a multi-step grid (padding + cross-step
    #     accumulator exercised via a small forced tile) ---
    N2, C2 = 1500, 6
    yt_l = jax.random.randint(k3, (N2,), 0, C2, dtype=jnp.int32)
    yp_l = jax.random.randint(k4, (N2,), 0, C2, dtype=jnp.int32)
    w_l = jax.random.uniform(k1, (C2,), dtype=jnp.float32) + 0.1

    acc2, t2 = accuracy(yp_l, yt_l, w_l, max_tile_rows=8)   # grid of 2 steps
    jax.block_until_ready((acc2, t2))
    wg2 = w_l[yt_l]
    c2_ref = jnp.sum(wg2 * (yt_l == yp_l).astype(jnp.float32))
    t2_ref = jnp.sum(wg2)
    assert jnp.allclose(acc2, c2_ref / t2_ref, rtol=1e-5, atol=1e-5)
    assert jnp.allclose(t2, t2_ref, rtol=1e-5, atol=1e-5)

    acc3, t3 = accuracy(yp_l, yt_l, None, max_tile_rows=8)
    jax.block_until_ready((acc3, t3))
    ref_acc3 = jnp.mean((yt_l == yp_l).astype(jnp.float32))
    assert jnp.allclose(acc3, ref_acc3, rtol=1e-6, atol=1e-6)
    assert jnp.allclose(t3, jnp.float32(N2), rtol=1e-6, atol=1e-6)

    # --- large class count -> wrapper-gather path (multi-step grid) ---
    N3, C3 = 2000, 40
    yt_g = jax.random.randint(k2, (N3,), 0, C3, dtype=jnp.int32)
    yp_g = jax.random.randint(k3, (N3,), 0, C3, dtype=jnp.int32)
    w_gt = jax.random.uniform(k4, (C3,), dtype=jnp.float32) + 0.1

    acc4, t4 = accuracy(yp_g, yt_g, w_gt, max_tile_rows=8)
    jax.block_until_ready((acc4, t4))
    wg4 = w_gt[yt_g]
    c4_ref = jnp.sum(wg4 * (yt_g == yp_g).astype(jnp.float32))
    t4_ref = jnp.sum(wg4)
    assert jnp.allclose(acc4, c4_ref / t4_ref, rtol=1e-5, atol=1e-5)
    assert jnp.allclose(t4, t4_ref, rtol=1e-5, atol=1e-5)

    print("KERNEL_OK")
</pallas_src>

<mosaic_0001>
module attributes {stable_mosaic.version = 11 : i64} {
  func.func @_accuracy_weighted_kernel(%arg0: i32, %arg1: memref<4xf32, #tpu.memory_space<smem>>, %arg2: memref<8x128xi32, #tpu.memory_space<vmem>>, %arg3: memref<8x128xi32, #tpu.memory_space<vmem>>, %arg4: memref<1x1xf32, #tpu.memory_space<vmem>>, %arg5: memref<1x1xf32, #tpu.memory_space<vmem>>, %arg6: memref<8x128xf32, #tpu.memory_space<vmem>>, %arg7: memref<8x128xf32, #tpu.memory_space<vmem>>, %arg8: memref<8x128xf32, #tpu.memory_space<vmem>>) attributes {dimension_semantics = [#tpu.dimension_semantics<arbitrary>], iteration_bounds = array<i64: 1>, scalar_prefetch = 0 : i64, scratch_operands = 3 : i64, tpu.core_type = #tpu.core_type<tc>, window_params = [{transform_indices = @transform_0, window_bounds = array<i64: 4>}, {transform_indices = @transform_1, window_bounds = array<i64: 8, 128>}, {transform_indices = @transform_2, window_bounds = array<i64: 8, 128>}, {pipeline_mode = #tpu.pipeline_mode<synchronous>, transform_indices = @transform_3, window_bounds = array<i64: 1, 1>}, {pipeline_mode = #tpu.pipeline_mode<synchronous>, transform_indices = @transform_4, window_bounds = array<i64: 1, 1>}]} {
    %c0_i32 = arith.constant 0 : i32
    %0 = arith.cmpi eq, %arg0, %c0_i32 : i32
    %1 = arith.extui %0 : i1 to i32
    %c0_i32_0 = arith.constant 0 : i32
    %2 = arith.cmpi ne, %1, %c0_i32_0 : i32
    scf.if %2 {
      %cst_40 = arith.constant 0.000000e+00 : f32
      %57 = vector.broadcast %cst_40 : f32 to vector<8x128xf32>
      %c0_41 = arith.constant 0 : index
      %c0_42 = arith.constant 0 : index
      %58 = vector.load %arg6[%c0_41, %c0_42] : memref<8x128xf32, #tpu.memory_space<vmem>>, vector<8x128xf32>
      tpu.vector_store %arg6[%c0_41, %c0_42], %57 {strides = array<i32>} : memref<8x128xf32, #tpu.memory_space<vmem>>, vector<8x128xf32>,
      %cst_43 = arith.constant 0.000000e+00 : f32
      %59 = vector.broadcast %cst_43 : f32 to vector<8x128xf32>
      %c0_44 = arith.constant 0 : index
      %c0_45 = arith.constant 0 : index
      %60 = vector.load %arg7[%c0_44, %c0_45] : memref<8x128xf32, #tpu.memory_space<vmem>>, vector<8x128xf32>
      tpu.vector_store %arg7[%c0_44, %c0_45], %59 {strides = array<i32>} : memref<8x128xf32, #tpu.memory_space<vmem>>, vector<8x128xf32>,
    } else {
    }
    %c0 = arith.constant 0 : index
    %c0_1 = arith.constant 0 : index
    %3 = vector.load %arg3[%c0, %c0_1] : memref<8x128xi32, #tpu.memory_space<vmem>>, vector<8x128xi32>
    %cst = arith.constant 0.000000e+00 : f32
    %4 = vector.broadcast %cst : f32 to vector<8x128xf32>
    %c0_2 = arith.constant 0 : index
    %c0_3 = arith.constant 0 : index
    %5 = vector.load %arg8[%c0_2, %c0_3] : memref<8x128xf32, #tpu.memory_space<vmem>>, vector<8x128xf32>
    tpu.vector_store %arg8[%c0_2, %c0_3], %4 {strides = array<i32>} : memref<8x128xf32, #tpu.memory_space<vmem>>, vector<8x128xf32>,
    %c0_4 = arith.constant 0 : index
    %c0_5 = arith.constant 0 : index
    %6 = vector.load %arg8[%c0_4, %c0_5] : memref<8x128xf32, #tpu.memory_space<vmem>>, vector<8x128xf32>
    %c0_i32_6 = arith.constant 0 : i32
    %7 = vector.broadcast %c0_i32_6 : i32 to vector<8x128xi32>
    %8 = arith.cmpi eq, %3, %7 : vector<8x128xi32>
    %c0_7 = arith.constant 0 : index
    %9 = memref.load %arg1[%c0_7] : memref<4xf32, #tpu.memory_space<smem>>
    %cst_8 = arith.constant 0.000000e+00 : f32
    %10 = vector.broadcast %9 : f32 to vector<8x128xf32>
    %11 = vector.broadcast %cst_8 : f32 to vector<8x128xf32>
    %12 = arith.select %8, %10, %11 : vector<8x128xi1>, vector<8x128xf32>
    %13 = arith.addf %6, %12 : vector<8x128xf32>
    %c0_9 = arith.constant 0 : index
    %c0_10 = arith.constant 0 : index
    %14 = vector.load %arg8[%c0_9, %c0_10] : memref<8x128xf32, #tpu.memory_space<vmem>>, vector<8x128xf32>
    tpu.vector_store %arg8[%c0_9, %c0_10], %13 {strides = array<i32>} : memref<8x128xf32, #tpu.memory_space<vmem>>, vector<8x128xf32>,
    %c0_11 = arith.constant 0 : index
    %c0_12 = arith.constant 0 : index
    %15 = vector.load %arg8[%c0_11, %c0_12] : memref<8x128xf32, #tpu.memory_space<vmem>>, vector<8x128xf32>
    %c1_i32 = arith.constant 1 : i32
    %16 = vector.broadcast %c1_i32 : i32 to vector<8x128xi32>
    %17 = arith.cmpi eq, %3, %16 : vector<8x128xi32>
    %c1 = arith.constant 1 : index
    %18 = memref.load %arg1[%c1] : memref<4xf32, #tpu.memory_space<smem>>
    %cst_13 = arith.constant 0.000000e+00 : f32
    %19 = vector.broadcast %18 : f32 to vector<8x128xf32>
    %20 = vector.broadcast %cst_13 : f32 to vector<8x128xf32>
    %21 = arith.select %17, %19, %20 : vector<8x128xi1>, vector<8x128xf32>
    %22 = arith.addf %15, %21 : vector<8x128xf32>
    %c0_14 = arith.constant 0 : index
    %c0_15 = arith.constant 0 : index
    %23 = vector.load %arg8[%c0_14, %c0_15] : memref<8x128xf32, #tpu.memory_space<vmem>>, vector<8x128xf32>
    tpu.vector_store %arg8[%c0_14, %c0_15], %22 {strides = array<i32>} : memref<8x128xf32, #tpu.memory_space<vmem>>, vector<8x128xf32>,
    %c0_16 = arith.constant 0 : index
    %c0_17 = arith.constant 0 : index
    %24 = vector.load %arg8[%c0_16, %c0_17] : memref<8x128xf32, #tpu.memory_space<vmem>>, vector<8x128xf32>
    %c2_i32 = arith.constant 2 : i32
    %25 = vector.broadcast %c2_i32 : i32 to vector<8x128xi32>
    %26 = arith.cmpi eq, %3, %25 : vector<8x128xi32>
    %c2 = arith.constant 2 : index
    %27 = memref.load %arg1[%c2] : memref<4xf32, #tpu.memory_space<smem>>
    %cst_18 = arith.constant 0.000000e+00 : f32
    %28 = vector.broadcast %27 : f32 to vector<8x128xf32>
    %29 = vector.broadcast %cst_18 : f32 to vector<8x128xf32>
    %30 = arith.select %26, %28, %29 : vector<8x128xi1>, vector<8x128xf32>
    %31 = arith.addf %24, %30 : vector<8x128xf32>
    %c0_19 = arith.constant 0 : index
    %c0_20 = arith.constant 0 : index
    %32 = vector.load %arg8[%c0_19, %c0_20] : memref<8x128xf32, #tpu.memory_space<vmem>>, vector<8x128xf32>
    tpu.vector_store %arg8[%c0_19, %c0_20], %31 {strides = array<i32>} : memref<8x128xf32, #tpu.memory_space<vmem>>, vector<8x128xf32>,
    %c0_21 = arith.constant 0 : index
    %c0_22 = arith.constant 0 : index
    %33 = vector.load %arg8[%c0_21, %c0_22] : memref<8x128xf32, #tpu.memory_space<vmem>>, vector<8x128xf32>
    %c3_i32 = arith.constant 3 : i32
    %34 = vector.broadcast %c3_i32 : i32 to vector<8x128xi32>
    %35 = arith.cmpi eq, %3, %34 : vector<8x128xi32>
    %c3 = arith.constant 3 : index
    %36 = memref.load %arg1[%c3] : memref<4xf32, #tpu.memory_space<smem>>
    %cst_23 = arith.constant 0.000000e+00 : f32
    %37 = vector.broadcast %36 : f32 to vector<8x128xf32>
    %38 = vector.broadcast %cst_23 : f32 to vector<8x128xf32>
    %39 = arith.select %35, %37, %38 : vector<8x128xi1>, vector<8x128xf32>
    %40 = arith.addf %33, %39 : vector<8x128xf32>
    %c0_24 = arith.constant 0 : index
    %c0_25 = arith.constant 0 : index
    %41 = vector.load %arg8[%c0_24, %c0_25] : memref<8x128xf32, #tpu.memory_space<vmem>>, vector<8x128xf32>
    tpu.vector_store %arg8[%c0_24, %c0_25], %40 {strides = array<i32>} : memref<8x128xf32, #tpu.memory_space<vmem>>, vector<8x128xf32>,
    %c0_26 = arith.constant 0 : index
    %c0_27 = arith.constant 0 : index
    %42 = vector.load %arg8[%c0_26, %c0_27] : memref<8x128xf32, #tpu.memory_space<vmem>>, vector<8x128xf32>
    %c0_28 = arith.constant 0 : index
    %c0_29 = arith.constant 0 : index
    %43 = vector.load %arg7[%c0_28, %c0_29] : memref<8x128xf32, #tpu.memory_space<vmem>>, vector<8x128xf32>
    %44 = arith.addf %43, %42 : vector<8x128xf32>
    %c0_30 = arith.constant 0 : index
    %c0_31 = arith.constant 0 : index
    %45 = vector.load %arg7[%c0_30, %c0_31] : memref<8x128xf32, #tpu.memory_space<vmem>>, vector<8x128xf32>
    tpu.vector_store %arg7[%c0_30, %c0_31], %44 {strides = array<i32>} : memref<8x128xf32, #tpu.memory_space<vmem>>, vector<8x128xf32>,
    %c0_32 = arith.constant 0 : index
    %c0_33 = arith.constant 0 : index
    %46 = vector.load %arg6[%c0_32, %c0_33] : memref<8x128xf32, #tpu.memory_space<vmem>>, vector<8x128xf32>
    %c0_34 = arith.constant 0 : index
    %c0_35 = arith.constant 0 : index
    %47 = vector.load %arg2[%c0_34, %c0_35] : memref<8x128xi32, #tpu.memory_space<vmem>>, vector<8x128xi32>
    %48 = arith.cmpi eq, %3, %47 : vector<8x128xi32>
    %49 = arith.extui %48 : vector<8x128xi1> to vector<8x128xi32>
    %50 = arith.sitofp %49 : vector<8x128xi32> to vector<8x128xf32>
    %51 = arith.mulf %42, %50 : vector<8x128xf32>
    %52 = arith.addf %46, %51 : vector<8x128xf32>
    %c0_36 = arith.constant 0 : index
    %c0_37 = arith.constant 0 : index
    %53 = vector.load %arg6[%c0_36, %c0_37] : memref<8x128xf32, #tpu.memory_space<vmem>>, vector<8x128xf32>
    tpu.vector_store %arg6[%c0_36, %c0_37], %52 {strides = array<i32>} : memref<8x128xf32, #tpu.memory_space<vmem>>, vector<8x128xf32>,
    %c0_i32_38 = arith.constant 0 : i32
    %54 = arith.cmpi eq, %arg0, %c0_i32_38 : i32
    %55 = arith.extui %54 : i1 to i32
    %c0_i32_39 = arith.constant 0 : i32
    %56 = arith.cmpi ne, %55, %c0_i32_39 : i32
    scf.if %56 {
      %c0_40 = arith.constant 0 : index
      %c0_41 = arith.constant 0 : index
      %57 = vector.load %arg6[%c0_40, %c0_41] : memref<8x128xf32, #tpu.memory_space<vmem>>, vector<8x128xf32>
      %58 = vector.shape_cast %57 : vector<8x128xf32> to vector<1x8x128xf32>
      %cst_42 = arith.constant dense<0.000000e+00> : vector<1xf32>
      %59 = vector.multi_reduction <add>, %58, %cst_42 [1, 2] : vector<1x8x128xf32> to vector<1xf32>
      %60 = vector.shape_cast %59 : vector<1xf32> to vector<1x1x1xf32>
      %61 = vector.extract %60[0, 0, 0] : f32 from vector<1x1x1xf32>
      %62 = vector.broadcast %61 : f32 to vector<1x1xf32>
      %c0_43 = arith.constant 0 : index
      %c0_44 = arith.constant 0 : index
      %63 = vector.load %arg7[%c0_43, %c0_44] : memref<8x128xf32, #tpu.memory_space<vmem>>, vector<8x128xf32>
      %64 = vector.shape_cast %63 : vector<8x128xf32> to vector<1x8x128xf32>
      %cst_45 = arith.constant dense<0.000000e+00> : vector<1xf32>
      %65 = vector.multi_reduction <add>, %64, %cst_45 [1, 2] : vector<1x8x128xf32> to vector<1xf32>
      %66 = vector.shape_cast %65 : vector<1xf32> to vector<1x1x1xf32>
      %67 = vector.extract %66[0, 0, 0] : f32 from vector<1x1x1xf32>
      %68 = vector.broadcast %67 : f32 to vector<1x1xf32>
      %69 = arith.divf %62, %68 : vector<1x1xf32>
      %c0_46 = arith.constant 0 : index
      %c0_47 = arith.constant 0 : index
      %70 = vector.load %arg4[%c0_46, %c0_47] : memref<1x1xf32, #tpu.memory_space<vmem>>, vector<1x1xf32>
      tpu.vector_store %arg4[%c0_46, %c0_47], %69 {strides = array<i32>} : memref<1x1xf32, #tpu.memory_space<vmem>>, vector<1x1xf32>,
      %c0_48 = arith.constant 0 : index
      %c0_49 = arith.constant 0 : index
      %71 = vector.load %arg5[%c0_48, %c0_49] : memref<1x1xf32, #tpu.memory_space<vmem>>, vector<1x1xf32>
      tpu.vector_store %arg5[%c0_48, %c0_49], %68 {strides = array<i32>} : memref<1x1xf32, #tpu.memory_space<vmem>>, vector<1x1xf32>,
    } else {
    }
    return
  }
  func.func @transform_0(%arg0: i32) -> i32 {
    %c0_i32 = arith.constant 0 : i32
    %c0_i32_0 = arith.constant 0 : i32
    return %c0_i32 : i32
  }
  func.func @transform_1(%arg0: i32) -> (i32, i32) {
    %c0_i32 = arith.constant 0 : i32
    %c0_i32_0 = arith.constant 0 : i32
    return %arg0, %c0_i32 : i32, i32
  }
  func.func @transform_2(%arg0: i32) -> (i32, i32) {
    %c0_i32 = arith.constant 0 : i32
    %c0_i32_0 = arith.constant 0 : i32
    return %arg0, %c0_i32 : i32, i32
  }
  func.func @transform_3(%arg0: i32) -> (i32, i32) {
    %c0_i32 = arith.constant 0 : i32
    %c0_i32_0 = arith.constant 0 : i32
    %c0_i32_1 = arith.constant 0 : i32
    return %c0_i32, %c0_i32_0 : i32, i32
  }
  func.func @transform_4(%arg0: i32) -> (i32, i32) {
    %c0_i32 = arith.constant 0 : i32
    %c0_i32_0 = arith.constant 0 : i32
    %c0_i32_1 = arith.constant 0 : i32
    return %c0_i32, %c0_i32_0 : i32, i32
  }
}

</mosaic_0001>

<bundles_post_ra>
// kernel: tpu_custom_call.1
= control target key start
LH: loop header
LB: loop body
LE: loop exit
PB: predicated region body
PF: predicated region fallthrough
CT: control target
= control target key end

     0   :  { %10 = vsyncpa [#allocation8], 0  ;;  %s324_s0 = inlined_call_operand.hbm [shape: f32[4], index: 0, kind: input, shape index: {}]   ;;  %s325_s1 = inlined_call_operand.hbm [shape: s32[8,128], index: 1, kind: input, shape index: {}]   ;;  %s326_s2 = inlined_call_operand.hbm [shape: s32[8,128], index: 2, kind: input, shape index: {}]   ;;  %s327_s3 = inlined_call_operand.hbm [shape: f32[1,1], index: 3, kind: output, shape index: {0}]   ;;  %s328_s4 = inlined_call_operand.hbm [shape: f32[1,1], index: 4, kind: output, shape index: {1}]  }
   0x1   :  { %11 = vsyncpa [#allocation6], 0 }
   0x2   :  { %12 = vsyncpa [#allocation11], 0 }
   0x3   :  { %13 = vsyncpa [#allocation7], 0 }
   0x4   :  { %14 = vsyncpa [#allocation14], 0  ;;  %s276_s15 = smov [#allocation5]   ;;  %s277_s18 = smov [#allocation9]  }
   0x5   :  { %22 = dma.hbm_to_smem %s324_s0, 16, %s276_s15, [#allocation8]  }
   0x6   :  { %s29_s19 = sshll.u32 %s277_s18, 4  ;;  %s278_s20 = smov [#allocation10]   ;;  %s30_s19 = int_to_ptr.vmem [resolvable:$true] %s29_s19 }
   0x7   :  { %s39_s21 = sshll.u32 %s278_s20, 4  ;;  %s194_s22 = scalar_lea.vmem %s30_s19, 128  ;;  %s40_s21 = int_to_ptr.vmem [resolvable:$true] %s39_s21 }
   0x8   :  { %p195_p0 = scmp.ne.s32.totalorder %s30_s19, %s194_s22  ;;  %p199_p1 = scmp.lt.s32.totalorder %s30_s19, %s30_s19 }
   0x9   :  { %p200_p2 = scmp.lt.s32.totalorder %s194_s22, %s194_s22 }
   0xb   :  { %p201_p3 = por %p200_p2, %p199_p1 }
   0xd   :  { %p202_p4 = pnand %p201_p3, %p195_p0 }
   0xf   :  { %205 = shalt.err (!%p202_p4)
}
  0x10   :  { %32 = dma.hbm_to_vmem [thread:$0]  %s325_s1, 128, %s30_s19, [#allocation6]  }
  0x11   :  { %s214_s25 = scalar_lea.vmem %s40_s21, 128  ;;  %p219_p6 = scmp.lt.s32.totalorder %s40_s21, %s40_s21 }
  0x12   :  { %p215_p5 = scmp.ne.s32.totalorder %s40_s21, %s214_s25  ;;  %p220_p7 = scmp.lt.s32.totalorder %s214_s25, %s214_s25 }
  0x14   :  { %p221_p8 = por %p220_p7, %p219_p6 }
  0x16   :  { %p222_p9 = pnand %p221_p8, %p215_p5 }
  0x18   :  { %225 = shalt.err (!%p222_p9)
}
  0x19   :  { %42 = dma.hbm_to_vmem [thread:$0]  %s326_s2, 128, %s40_s21, [#allocation11]  }
  0x1a   :  { %266 = dma.done.wait [#allocation8], 16  }
  0x1b   :  { %267 = vsyncadd [#allocation8], 4294967280 }
  0x1c   :  { %268 = dma.done.wait [#allocation6], 128  }
  0x1d   :  { %269 = vsyncadd [#allocation6], 4294967168 }
  0x1e   :  { %270 = dma.done.wait [#allocation11], 128  }
  0x1f   :  { %271 = vsyncadd [#allocation11], 4294967168 }
  0x20   :  { %52 = sfence }
  0x21   :  { %s63_s1 = sld [smem:[#allocation5]]  ;;  %v59_v0 = vld [vmem:[#allocation10] sm:$0xff]  ;;  %v94_v2 = vld [vmem:[#allocation9] sm:$0xff]  ;;  %v279_v12 = vmov 0.0   ;;  %s280_s2 = smov [#allocation13]   ;;  %vm128_vm5 = vcmask 0  }
  0x22   :  { %s162_s27 = sld [smem:[#allocation5 + $0x1]]  ;;  %vm62_vm0 = vcmp.eq.s32.totalorder %v59_v0, 0  ;;  %vm69_vm1 = vcmp.eq.s32.totalorder %v59_v0, 1  ;;  %vm76_vm2 = vcmp.eq.s32.totalorder %v59_v0, 2  ;;  %vm83_vm3 = vcmp.eq.s32.totalorder %v59_v0, 3  ;;  %s147_s30 = sshll.u32 %s280_s2, 4  ;;  %s148_s30 = int_to_ptr.vmem [resolvable:$true] %s147_s30 }
  0x23   :  { %s163_s28 = sld [smem:[#allocation5 + $0x2]]  ;;  %vm95_vm4 = vcmp.eq.s32.totalorder %v59_v0, %v94_v2  ;;  %s226_s7 = scalar_lea.vmem %s148_s30, 16 }
  0x24   :  { %s164_s29 = sld [smem:[#allocation5 + $0x3]]  ;;  %v165_v13 = vsel %vm95_vm4, 1.0, %v279_v12  ;;  %p227_p10 = scmp.ne.s32.totalorder %s148_s30, %s226_s7 }
  0x25   :  { %s230_s8 = scalar_lea.vmem %s148_s30, 32  ;;  %p231_p11 = scmp.lt.s32.totalorder %s148_s30, %s148_s30 }
  0x26   :  { %p232_p12 = scmp.lt.s32.totalorder %s230_s8, %s226_s7 }
  0x27   :  { %v64_v1 = vstv %s63_s1 }
  0x28   :  { %v65_v3 = vsel %vm62_vm0, %v64_v1, 0.0  ;;  %v71_v4 = vstv %s162_s27  ;;  %p233_p13 = por %p232_p12, %p231_p11 }
  0x29   :  { %v72_v5 = vsel %vm69_vm1, %v71_v4, 0.0  ;;  %v78_v6 = vstv %s163_s28 }
  0x2a   :  { %v73_v7 = vadd.f32 %v72_v5, %v65_v3  ;;  %v79_v8 = vsel %vm76_vm2, %v78_v6, 0.0  ;;  %v85_v9 = vstv %s164_s29  ;;  %p234_p0 = pnand %p233_p13, %p227_p10 }
  0x2b   :  { %v86_v10 = vsel %vm83_vm3, %v85_v9, 0.0 }
  0x2c   :  { %v80_v11 = vadd.f32 %v79_v8, %v73_v7 }
  0x2e   :  { %v87_v14 = vadd.f32 %v86_v10, %v80_v11 }
  0x30   :  { %v98_v15 = vmul.f32 %v165_v13, %v87_v14 }
  0x32   :  { %105 = vadd.xlane.f32.xlu0 %v98_v15 }
  0x36   :  { %116 = vadd.xlane.f32.xlu0 %v87_v14 }
  0xbb   :  { %v106_v16 = vpop.xlane.xlu0 %105 }
  0xbc   :  { %v107_v17 = vrot.slane %v106_v16, 4 }
  0xbe   :  { %v108_v18 = vadd.f32 %v107_v17, %v106_v16 }
  0xbf   :  { %v117_v19 = vpop.xlane.xlu0 %116 }
  0xc0   :  { %v109_v20 = vrot.slane %v108_v18, 2  ;;  %v118_v21 = vrot.slane %v117_v19, 4 }
  0xc2   :  { %v119_v22 = vadd.f32 %v118_v21, %v117_v19  ;;  %v110_v23 = vadd.f32 %v109_v20, %v108_v18 }
  0xc4   :  { %v120_v24 = vrot.slane %v119_v22, 2  ;;  %v111_v25 = vrot.slane %v110_v23, 1 }
  0xc6   :  { %v121_v26 = vadd.f32 %v120_v24, %v119_v22  ;;  %v112_v27 = vadd.f32 %v111_v25, %v110_v23 }
  0xc8   :  { %166 = vpush %v112_v27  ;;  %v122_v28 = vrot.slane %v121_v26, 1 }
  0xca   :  { %v123_v29 = vadd.f32 %v122_v28, %v121_v26 }
  0xcc   :  { %168 = vpush %v123_v29 }
  0xf9   :  { %s167_s5 = spop %166 }
  0xfd   :  { %s169_s6 = spop %168 }
  0xfe   :  { %v125_v30 = vstv %s169_s6 }
  0xff   :  { %176 = vrcp.f32 %v125_v30  ;;  %130 = vst.msk [vmem:[#allocation13] sm:$0x1] %vm128_vm5, %v125_v30 }
 0x100   :  { %237 = shalt.err (!%p234_p0)
}
 0x101   :  { %150 = dma.vmem_to_hbm [thread:$0]  %s148_s30, 16, %s328_s4, [#allocation14]   ;;  %v114_v32 = vstv %s167_s5 }
 0x102   :  { %s281_s11 = smov [#allocation12]  }
 0x103   :  { %s137_s12 = sshll.u32 %s281_s11, 4  ;;  %s138_s12 = int_to_ptr.vmem [resolvable:$true] %s137_s12 }
 0x104   :  { %s246_s13 = scalar_lea.vmem %s138_s12, 16  ;;  %s250_s14 = scalar_lea.vmem %s138_s12, 32 }
 0x105   :  { %p247_p1 = scmp.ne.s32.totalorder %s138_s12, %s246_s13  ;;  %p251_p2 = scmp.lt.s32.totalorder %s138_s12, %s138_s12 }
 0x106   :  { %p252_p3 = scmp.lt.s32.totalorder %s250_s14, %s246_s13 }
 0x108   :  { %p253_p4 = por %p252_p3, %p251_p2 }
 0x10a   :  { %p254_p5 = pnand %p253_p4, %p247_p1 }
 0x10c   :  { %v177_v31 = vpop.eup %176 }
 0x10d   :  { %v127_v33 = vmul.f32 %v177_v31, %v114_v32 }
 0x10f   :  { %129 = vst.msk [vmem:[#allocation12] sm:$0x1] %vm128_vm5, %v127_v33 }
 0x110   :  { %257 = shalt.err (!%p254_p5)
}
 0x111   :  { %140 = dma.vmem_to_hbm [thread:$0]  %s138_s12, 16, %s327_s3, [#allocation7]  }
 0x112   :  { %272 = dma.done.wait [#allocation7], 16  }
 0x113   :  { %273 = vsyncadd [#allocation7], 4294967280 }
 0x114   :  { %274 = dma.done.wait [#allocation14], 16  }
 0x115   :  { %275 = vsyncadd [#allocation14], 4294967280 }
 0x116   :  { %157 = vsyncpa [#allocation6], 1 }
 0x117   :  { %158 = vsyncpa [#allocation11], 1 }
 0x118   :  { %159 = vsyncpa [#allocation7], 1 }
 0x119   :  { %160 = vsyncpa [#allocation14], 1 }
 0x11a   :  { %161 = vsyncpa [#allocation8], 1 }

</bundles_post_ra>
